<compile_context>
chip_gen: v7x
topology: tpu7x:2x2x1
jax: 0.10.0
libtpu: 0.0.40
codegen_flags: <defaults>
</compile_context>

<pallas_src>
import math

import jax
import jax.numpy as jnp
from jax.experimental import pallas as pl
from jax.experimental.pallas import tpu as pltpu

_LANES = 128
_SUBLANES = 8
_TILE_TARGET_BYTES = 8 * 1024 * 1024   # per X tile (Pallas double-buffers it)


def _round_up(x, m):
    return -(-x // m) * m


def _cdiv(a, b):
    return -(-a // b)


def _vmem_capacity_bytes():
    try:
        return int(pltpu.get_tpu_info().vmem_capacity_bytes)
    except Exception:
        return 64 * 1024 * 1024         # conservative: v7x per-TensorCore VMEM


def _linear_kernel(x_ref, w_ref, b_ref, o_ref):
    # x_ref: (BR, C) VMEM X tile        w_ref: (P, C) VMEM (grid-resident)
    # b_ref: (1, 1) SMEM scalar bias    o_ref: (P, BR) VMEM, lane-dense
    # MXU contraction over C; result is already lane-dense (no XLU relayout).
    y = jax.lax.dot_general(
        w_ref[...], x_ref[...],
        dimension_numbers=(((1,), (1,)), ((), ())),
        preferred_element_type=jnp.float32,
    )
    o_ref[...] = (y + b_ref[0, 0]).astype(o_ref.dtype)


def _choose_block_rows(rows_total, row_vmem_bytes, capacity):
    """Pick per-tile row count (rows of the folded X2 array) and tile count."""
    if rows_total <= 2 * _LANES:
        return rows_total, 1            # single full-extent block (always legal)
    target = max(_LANES * row_vmem_bytes, min(_TILE_TARGET_BYTES, capacity // 8))
    block_rows = max(_LANES, (target // row_vmem_bytes) // _LANES * _LANES)
    # Keep >= 2 tiles so both v7x TensorCores get work on the "parallel" axis.
    block_rows = min(block_rows, max(_LANES, _round_up(_cdiv(rows_total, 2), _LANES)))
    return block_rows, _cdiv(rows_total, block_rows)


def linear_regression_forward(x, weight, bias):
    """Forward pass of nn.Linear(features_num, 1).

    Args:
      x:      (batch, features) float32
      weight: (1, features) float32  (PyTorch nn.Linear weight layout)
      bias:   (1,) float32
    Returns:
      (batch, 1) float32
    """
    batch, features = x.shape
    itemsize = x.dtype.itemsize

    # Fold k rows into the lane axis when features < 128 (free contiguous reshape).
    k = 1
    if features < _LANES:
        kk = _LANES // features
        if kk > 1 and batch % kk == 0:
            k = kk

    rows_total = batch // k             # rows of the folded X2
    c = k * features                    # folded contraction width
    p = k                               # rows of the folded weight / output

    x2 = x.reshape(rows_total, c)       # contiguous -> free
    if k == 1:
        w2 = weight                     # (1, F)
    else:
        # Block-diagonal weight (transposed layout): w2[j, j*F:(j+1)*F] = weight[0]
        eye = jnp.eye(k, dtype=weight.dtype)
        w2 = (eye[:, :, None] * weight[0][None, None, :]).reshape(k, c)
    b2 = bias.reshape(1, 1)

    capacity = _vmem_capacity_bytes()
    c_pad = _round_up(c, _LANES)
    row_vmem_bytes = c_pad * itemsize
    block_rows, num_tiles = _choose_block_rows(rows_total, row_vmem_bytes, capacity)

    # VMEM need: double-buffered X + out tiles, resident weight, compiler slack.
    x_tile_vmem = _round_up(block_rows, _SUBLANES) * row_vmem_bytes
    o_tile_vmem = _round_up(p, _SUBLANES) * _round_up(block_rows, _LANES) * itemsize
    w_vmem = _round_up(p, _SUBLANES) * row_vmem_bytes
    needed = 2 * (x_tile_vmem + o_tile_vmem) + 2 * w_vmem + (1 << 20)
    vmem_limit = int(min(max(needed, 32 * 1024 * 1024), capacity * 3 // 4))

    cost = pl.CostEstimate(
        flops=2 * rows_total * c * p,
        transcendentals=0,
        bytes_accessed=(rows_total * c + p * c_pad
                        + p * _round_up(rows_total, _LANES) + 1) * itemsize,
    )

    # TODO(synk): for very wide features (128 rows * F * 4B >> 8 MiB) add a second
    # "arbitrary" grid axis over the contraction dim with a VMEM accumulator.
    out = pl.pallas_call(
        _linear_kernel,
        out_shape=jax.ShapeDtypeStruct((p, rows_total), x.dtype),
        grid=(num_tiles,),
        in_specs=[
            pl.BlockSpec((block_rows, c), lambda i: (i, 0)),
            pl.BlockSpec((p, c), lambda i: (0, 0)),
            pl.BlockSpec(memory_space=pltpu.MemorySpace.SMEM),
        ],
        out_specs=pl.BlockSpec((p, block_rows), lambda i: (0, i)),
        compiler_params=pltpu.CompilerParams(
            dimension_semantics=("parallel",),
            vmem_limit_bytes=vmem_limit,
        ),
        cost_estimate=cost,
    )(x2, w2, b2)

    # out[j, r] is the result for original row r*k + j  ->  (batch, 1).
    return out.T.reshape(batch, 1)


if __name__ == "__main__":
    features_num = 32
    batch = 8

    key = jax.random.PRNGKey(0)
    k_x, k_w, k_b = jax.random.split(key, 3)

    # Deterministic parameter init, matching nn.Linear default: U(-1/sqrt(F), 1/sqrt(F))
    bound = 1.0 / math.sqrt(features_num)
    weight = jax.random.uniform(
        k_w, (1, features_num), dtype=jnp.float32, minval=-bound, maxval=bound
    )
    bias = jax.random.uniform(
        k_b, (1,), dtype=jnp.float32, minval=-bound, maxval=bound
    )
    x = jax.random.normal(k_x, (batch, features_num), dtype=jnp.float32)

    out = jax.block_until_ready(linear_regression_forward(x, weight, bias))

    # Reference check in plain JAX
    ref = x @ weight.T + bias
    assert out.shape == (batch, 1)
    assert jnp.allclose(out, ref, atol=1e-5, rtol=1e-5)

    print("KERNEL_OK")
</pallas_src>

<mosaic_0001>
module attributes {stable_mosaic.version = 11 : i64} {
  func.func @_linear_kernel(%arg0: i32, %arg1: memref<2x128xf32, #tpu.memory_space<vmem>>, %arg2: memref<4x128xf32, #tpu.memory_space<vmem>>, %arg3: memref<1x1xf32, #tpu.memory_space<smem>>, %arg4: memref<4x2xf32, #tpu.memory_space<vmem>>) attributes {dimension_semantics = [#tpu.dimension_semantics<parallel>], iteration_bounds = array<i64: 1>, scalar_prefetch = 0 : i64, scratch_operands = 0 : i64, tpu.core_type = #tpu.core_type<tc>, window_params = [{transform_indices = @transform_0, window_bounds = array<i64: 2, 128>}, {pipeline_mode = #tpu.pipeline_mode<synchronous>, transform_indices = @transform_1, window_bounds = array<i64: 4, 128>}, {transform_indices = @transform_2, window_bounds = array<i64: 1, 1>}, {transform_indices = @transform_3, window_bounds = array<i64: 4, 2>}]} {
    %c0 = arith.constant 0 : index
    %c0_0 = arith.constant 0 : index
    %0 = vector.load %arg2[%c0, %c0_0] : memref<4x128xf32, #tpu.memory_space<vmem>>, vector<4x128xf32>
    %c0_1 = arith.constant 0 : index
    %c0_2 = arith.constant 0 : index
    %1 = vector.load %arg1[%c0_1, %c0_2] : memref<2x128xf32, #tpu.memory_space<vmem>>, vector<2x128xf32>
    %cst = arith.constant dense<0.000000e+00> : vector<4x2xf32>
    %2 = tpu.matmul %0, %1, %cst {dimension_numbers = #tpu.dot_dimension_numbers<[1], [1], [0], [0], [0, 0, 1, 0], [], []>} : vector<4x128xf32>, vector<2x128xf32>, vector<4x2xf32> -> vector<4x2xf32>
    %c0_3 = arith.constant 0 : index
    %c0_4 = arith.constant 0 : index
    %3 = memref.load %arg3[%c0_3, %c0_4] : memref<1x1xf32, #tpu.memory_space<smem>>
    %4 = vector.broadcast %3 : f32 to vector<4x2xf32>
    %5 = arith.addf %2, %4 : vector<4x2xf32>
    %c0_5 = arith.constant 0 : index
    %c0_6 = arith.constant 0 : index
    %6 = vector.load %arg4[%c0_5, %c0_6] : memref<4x2xf32, #tpu.memory_space<vmem>>, vector<4x2xf32>
    tpu.vector_store %arg4[%c0_5, %c0_6], %5 {strides = array<i32>} : memref<4x2xf32, #tpu.memory_space<vmem>>, vector<4x2xf32>,
    return
  }
  func.func @transform_0(%arg0: i32) -> (i32, i32) {
    %c0_i32 = arith.constant 0 : i32
    %c0_i32_0 = arith.constant 0 : i32
    return %arg0, %c0_i32 : i32, i32
  }
  func.func @transform_1(%arg0: i32) -> (i32, i32) {
    %c0_i32 = arith.constant 0 : i32
    %c0_i32_0 = arith.constant 0 : i32
    %c0_i32_1 = arith.constant 0 : i32
    return %c0_i32, %c0_i32_0 : i32, i32
  }
  func.func @transform_2(%arg0: i32) -> (i32, i32) {
    %c0_i32 = arith.constant 0 : i32
    %c0_i32_0 = arith.constant 0 : i32
    %c0_i32_1 = arith.constant 0 : i32
    return %c0_i32, %c0_i32_0 : i32, i32
  }
  func.func @transform_3(%arg0: i32) -> (i32, i32) {
    %c0_i32 = arith.constant 0 : i32
    %c0_i32_0 = arith.constant 0 : i32
    return %c0_i32, %arg0 : i32, i32
  }
}

</mosaic_0001>

<bundles_post_ra>
// kernel: tpu_custom_call.1
= control target key start
LH: loop header
LB: loop body
LE: loop exit
PB: predicated region body
PF: predicated region fallthrough
CT: control target
= control target key end

     0   :  { %v104_v0 = vmov 0.0   ;;  %vm105_vm0 = vmmov 0   ;;  %vm89_vm1 = vcmask 11264   ;;  %s138_s0 = inlined_call_operand.vmem [shape: f32[2,128], index: 0, kind: input, shape index: {}]   ;;  %s139_s1 = inlined_call_operand.vmem [shape: f32[4,128], index: 1, kind: input, shape index: {}]   ;;  %s140_s2 = inlined_call_operand.<no memory space> [shape: f32[1,1], index: 2, kind: input, shape index: {}]   ;;  %s141_s3 = inlined_call_operand.vmem [shape: f32[4,2], index: 3, kind: output, shape index: {}]  }
   0x1   :  { %97 = vmatprep.subr.mxu0 %v104_v0  ;;  %v16_v1 = vld [vmem:[%s138_s0] sm:$0x3]  ;;  %99 = vmatprep.mubr.msk.f32.mxu0 %vm105_vm0, %v104_v0  ;;  %v18_v3 = vstv %s140_s2 }
   0x2   :  { %98 = vmatpush3.xpose.msra.mxu0 %v16_v1  ;;  %v15_v2 = vld [vmem:[%s139_s1] sm:$0xf] }
   0x5   :  { %100 = vmatmul.mubr.f32.vlgmr.msra.gmra.mrb[0].mxu0 %v15_v2 }
  0xd8   :  { %v85_v4 = vpop.f32.mrb[0].mxu0 }
  0xd9   :  { %v86_v5 = vadd.f32 %v85_v4, %v18_v3  ;;  %v101_v6 = vpop.f32.mrb[1].mxu0 }
  0xdb   :  { %90 = vst.msk [vmem:[%s141_s3] sm:$0xf] %vm89_vm1, %v86_v5 }

</bundles_post_ra>
